<compile_context>
chip_gen: v7x
topology: tpu7x:2x2x1
jax: 0.10.0
libtpu: 0.0.40
codegen_flags: <defaults>
</compile_context>

<pallas_src>
import functools

import jax
import jax.numpy as jnp
from jax.experimental import pallas as pl
from jax.experimental.pallas import tpu as pltpu


_POOL_CHUNK = 512                    # lanes per partial pool sum (small f32 temps)
_TARGET_BLOCK_BYTES = 2 << 20        # ~2 MiB blocks: safe + near-roofline on all gens
_FUSED_MAX_BLOCK_BYTES = 4 << 20     # above this, switch to the HW-tiled two-pass form
_VMEM_LIMIT_BYTES = 40 << 20         # > scoped defaults, < v7x 64 MiB physical


def _cdiv(a, b):
    return -(-a // b)


# --------------------------- in-kernel helpers ---------------------------

def _pool_sum_f32(x_ref, hw_limit=None, hw_base=None):
    """Sum x_ref (bblk, C, hw_blk) over the trailing (lane/HW) axis.

    Lane chunks are read straight from the ref and upcast chunk-by-chunk,
    accumulating in f32, so no full-block f32 copy is materialised.  If
    hw_limit is given, lanes whose global HW index >= hw_limit (ragged last
    HW tile) are excluded.
    """
    bblk, c, hw_blk = x_ref.shape
    acc = jnp.zeros((bblk, c), jnp.float32)
    for start in range(0, hw_blk, _POOL_CHUNK):
        size = min(_POOL_CHUNK, hw_blk - start)
        part = x_ref[:, :, start:start + size].astype(jnp.float32)
        if hw_limit is not None:
            lane = jax.lax.broadcasted_iota(jnp.int32, (bblk, c, size), 2)
            part = jnp.where((lane + (hw_base + start)) < hw_limit, part, 0.0)
        acc = acc + jnp.sum(part, axis=-1)
    return acc


def _excite(y_f32, w1t_ref, b1_ref, w2t_ref, b2_ref):
    """Pooled (bblk, C) -> Linear -> ReLU -> Linear -> Sigmoid, all in f32."""
    h = jnp.dot(y_f32, w1t_ref[...], preferred_element_type=jnp.float32) + b1_ref[...]
    h = jnp.maximum(h, 0.0)
    s = jnp.dot(h, w2t_ref[...], preferred_element_type=jnp.float32) + b2_ref[...]
    return jax.nn.sigmoid(s)


# ------------------------------- kernels --------------------------------

def _se_fused_kernel(inv_hw, x_ref, w1t_ref, b1_ref, w2t_ref, b2_ref, o_ref):
    # Single pass: pool + excite + gate on a (bblk, C, HW) block.
    s = _excite(_pool_sum_f32(x_ref) * inv_hw,
                w1t_ref, b1_ref, w2t_ref, b2_ref)                 # (bblk, C) f32
    x = x_ref[...]                                                # native dtype
    o_ref[...] = (x * s.astype(x.dtype)[:, :, None]).astype(o_ref.dtype)


def _se_scale_kernel(inv_hw, hw_total, hw_blk, mask_hw,
                     x_ref, w1t_ref, b1_ref, w2t_ref, b2_ref, s_ref, acc_ref):
    # Grid (batch parallel, HW arbitrary): pool accumulator + excite at the end.
    j = pl.program_id(1)

    @pl.when(j == 0)
    def _init():
        acc_ref[...] = jnp.zeros_like(acc_ref)

    limit = hw_total if mask_hw else None
    acc_ref[...] += _pool_sum_f32(x_ref, hw_limit=limit, hw_base=j * hw_blk)

    @pl.when(j == pl.num_programs(1) - 1)
    def _finalize():
        s = _excite(acc_ref[...] * inv_hw, w1t_ref, b1_ref, w2t_ref, b2_ref)
        s_ref[...] = s[:, None, :].astype(s_ref.dtype)            # (bblk, 1, C)


def _se_apply_kernel(x_ref, s_ref, o_ref):
    # Broadcast-multiply pass of the two-pass (HW-tiled) form.
    x = x_ref[...]
    s = s_ref[:, 0, :].astype(x.dtype)                            # (bblk, C)
    o_ref[...] = (x * s[:, :, None]).astype(o_ref.dtype)


# ------------------------------- planning -------------------------------

def _pick_hw_block(HW, bytes_per_pos, target_bytes):
    """HW tile for one batch row: full HW if it fits, else a multiple of 128
    under the target (preferring an exact divisor of HW so no masking)."""
    if HW * bytes_per_pos <= target_bytes:
        return HW, False
    blk = min(HW, max(128, (target_bytes // bytes_per_pos) // 128 * 128))
    if HW % blk == 0:
        return blk, False
    for cand in range(blk, 127, -128):
        if HW % cand == 0:
            return cand, False
    return blk, True                                              # ragged -> mask in kernel


def _pick_batch_block(B, bytes_per_batch_block, n_hw_steps, target_bytes):
    """Batch tile: fill up to ~target_bytes, never collapse the grid to one
    step, and prefer an even number of batch steps (v7x has 2 TensorCores)."""
    bblk = max(1, min(B, target_bytes // max(bytes_per_batch_block, 1)))
    if B > 1 and n_hw_steps * _cdiv(B, bblk) == 1:
        bblk = _cdiv(B, 2)                                        # at least 2 grid steps
    if n_hw_steps == 1 and B >= 4 and bblk * bytes_per_batch_block >= (1 << 20):
        bblk = min(bblk, _cdiv(B, 4))                             # a few steps to pipeline
    steps = _cdiv(B, bblk)
    if steps > 1 and steps % 2 == 1:
        for cand in (list(range(bblk + 1, min(B, 2 * bblk) + 1))
                     + list(range(bblk - 1, 0, -1))):
            if _cdiv(B, cand) % 2 == 0 and cand * bytes_per_batch_block <= 2 * target_bytes:
                return cand
    return bblk


# -------------------------------- wrapper --------------------------------

def se_layer(x, w1, b1, w2, b2, multiply=True,
             target_block_bytes=_TARGET_BLOCK_BYTES,
             fused_max_block_bytes=_FUSED_MAX_BLOCK_BYTES):
    """SELayer forward.  x: (B, C, H, W); w1: (Cr, C); b1: (Cr,); w2: (C, Cr); b2: (C,)."""
    B, C, H, W = x.shape
    HW = H * W
    Cr = w1.shape[0]
    itemsize = x.dtype.itemsize

    x3 = x.reshape(B, C, HW)               # free row-major reshape: C on sublanes, HW on lanes
    w1t = jnp.transpose(w1)                # (C, Cr)   tiny, once
    w2t = jnp.transpose(w2)                # (Cr, C)
    b1r = b1.reshape(1, Cr)
    b2r = b2.reshape(1, C)

    weight_specs = [
        pl.BlockSpec((C, Cr), lambda *_: (0, 0)),
        pl.BlockSpec((1, Cr), lambda *_: (0, 0)),
        pl.BlockSpec((Cr, C), lambda *_: (0, 0)),
        pl.BlockSpec((1, C), lambda *_: (0, 0)),
    ]
    weight_args = (w1t, b1r, w2t, b2r)
    inv_hw = 1.0 / float(HW)
    per_batch_bytes = C * HW * itemsize

    # ---- fused single-pass path (multiply=True, slab per batch fits VMEM) ----
    if multiply and per_batch_bytes <= fused_max_block_bytes:
        bblk = _pick_batch_block(B, per_batch_bytes, 1, target_block_bytes)
        grid = (_cdiv(B, bblk),)
        out = pl.pallas_call(
            functools.partial(_se_fused_kernel, inv_hw),
            out_shape=jax.ShapeDtypeStruct((B, C, HW), x.dtype),
            grid_spec=pltpu.PrefetchScalarGridSpec(
                num_scalar_prefetch=0,
                grid=grid,
                in_specs=[pl.BlockSpec((bblk, C, HW), lambda i: (i, 0, 0))] + weight_specs,
                out_specs=pl.BlockSpec((bblk, C, HW), lambda i: (i, 0, 0)),
            ),
            compiler_params=pltpu.CompilerParams(
                dimension_semantics=("parallel",),
                vmem_limit_bytes=_VMEM_LIMIT_BYTES),
            cost_estimate=pl.CostEstimate(
                flops=2 * B * C * HW + 4 * B * C * Cr,
                transcendentals=B * C,
                bytes_accessed=2 * B * C * HW * itemsize),
        )(x3, *weight_args)
        return out.reshape(B, C, H, W)

    # ---- HW-tiled path: scale pass (pool accumulator), then optional multiply ----
    hw_blk, mask_hw = _pick_hw_block(HW, C * itemsize, target_block_bytes)
    n_hw = _cdiv(HW, hw_blk)
    bblk = _pick_batch_block(B, C * hw_blk * itemsize, n_hw, target_block_bytes)
    nb = _cdiv(B, bblk)

    scale = pl.pallas_call(
        functools.partial(_se_scale_kernel, inv_hw, HW, hw_blk, mask_hw),
        out_shape=jax.ShapeDtypeStruct((B, 1, C), x.dtype),
        grid_spec=pltpu.PrefetchScalarGridSpec(
            num_scalar_prefetch=0,
            grid=(nb, n_hw),
            in_specs=[pl.BlockSpec((bblk, C, hw_blk), lambda i, j: (i, 0, j))] + weight_specs,
            out_specs=pl.BlockSpec((bblk, 1, C), lambda i, j: (i, 0, 0)),
            scratch_shapes=[pltpu.VMEM((bblk, C), jnp.float32)],
        ),
        compiler_params=pltpu.CompilerParams(
            dimension_semantics=("parallel", "arbitrary"),
            vmem_limit_bytes=_VMEM_LIMIT_BYTES),
        cost_estimate=pl.CostEstimate(
            flops=B * C * HW + 4 * B * C * Cr,
            transcendentals=B * C,
            bytes_accessed=B * C * HW * itemsize + B * C * itemsize),
    )(x3, *weight_args)

    if not multiply:
        return scale.reshape(B, C, 1, 1)

    out = pl.pallas_call(
        _se_apply_kernel,
        out_shape=jax.ShapeDtypeStruct((B, C, HW), x.dtype),
        grid_spec=pltpu.PrefetchScalarGridSpec(
            num_scalar_prefetch=0,
            grid=(nb, n_hw),
            in_specs=[pl.BlockSpec((bblk, C, hw_blk), lambda i, j: (i, 0, j)),
                      pl.BlockSpec((bblk, 1, C), lambda i, j: (i, 0, 0))],
            out_specs=pl.BlockSpec((bblk, C, hw_blk), lambda i, j: (i, 0, j)),
        ),
        compiler_params=pltpu.CompilerParams(
            dimension_semantics=("parallel", "parallel"),
            vmem_limit_bytes=_VMEM_LIMIT_BYTES),
        cost_estimate=pl.CostEstimate(
            flops=B * C * HW,
            transcendentals=0,
            bytes_accessed=2 * B * C * HW * itemsize + B * C * itemsize),
    )(x3, scale)
    return out.reshape(B, C, H, W)


def se_layer_ref(x, w1, b1, w2, b2, multiply=True):
    """Pure-JAX reference mirroring the PyTorch forward."""
    y = x.mean(axis=(2, 3))                                        # (B, C)
    h = jnp.maximum(y @ w1.T + b1, 0.0)                            # (B, Cr)
    s = jax.nn.sigmoid(h @ w2.T + b2)                              # (B, C)
    if multiply:
        return x * s[:, :, None, None]
    return s[:, :, None, None]


if __name__ == "__main__":
    # SELayer(channel=128, reduction=64) -> hidden width Cr = 128 // 64 = 2
    B, C, H, W = 2, 128, 16, 16
    reduction = 64
    Cr = C // reduction

    key = jax.random.PRNGKey(0)
    kx, k1, k2, k3, k4 = jax.random.split(key, 5)
    x = jax.random.normal(kx, (B, C, H, W), dtype=jnp.float32)
    # Deterministic synthetic parameters (nn.Linear shapes: (out, in) + bias).
    w1 = jax.random.normal(k1, (Cr, C), dtype=jnp.float32) * (1.0 / jnp.sqrt(C))
    b1 = jax.random.normal(k2, (Cr,), dtype=jnp.float32) * 0.1
    w2 = jax.random.normal(k3, (C, Cr), dtype=jnp.float32) * (1.0 / jnp.sqrt(Cr))
    b2 = jax.random.normal(k4, (C,), dtype=jnp.float32) * 0.1

    # 1) multiply=True via the fused single-pass kernel.
    out = jax.block_until_ready(se_layer(x, w1, b1, w2, b2, multiply=True))
    ref = se_layer_ref(x, w1, b1, w2, b2, multiply=True)
    assert out.shape == (B, C, H, W)
    assert jnp.allclose(out, ref, atol=1e-5, rtol=1e-5), "fused multiply mismatch"

    # 2) multiply=False (scale only; the big slab is never written back).
    sc = jax.block_until_ready(se_layer(x, w1, b1, w2, b2, multiply=False))
    sc_ref = se_layer_ref(x, w1, b1, w2, b2, multiply=False)
    assert sc.shape == (B, C, 1, 1)
    assert jnp.allclose(sc, sc_ref, atol=1e-5, rtol=1e-5), "scale mismatch"

    # 3) multiply=True via the HW-tiled two-pass path (forced small blocks):
    #    exercises the pool accumulator + broadcast-multiply kernels.
    out2 = jax.block_until_ready(
        se_layer(x, w1, b1, w2, b2, multiply=True,
                 target_block_bytes=64 * 1024, fused_max_block_bytes=0))
    assert jnp.allclose(out2, ref, atol=1e-5, rtol=1e-5), "tiled multiply mismatch"

    # 4) Ragged batch (B=3) and ragged HW tile (HW=169) paths.
    B2, H2, W2 = 3, 13, 13
    x2 = jax.random.normal(kx, (B2, C, H2, W2), dtype=jnp.float32)
    ref2 = se_layer_ref(x2, w1, b1, w2, b2, multiply=True)
    out3 = jax.block_until_ready(se_layer(x2, w1, b1, w2, b2, multiply=True))
    assert jnp.allclose(out3, ref2, atol=1e-5, rtol=1e-5), "ragged-batch mismatch"
    out4 = jax.block_until_ready(
        se_layer(x2, w1, b1, w2, b2, multiply=True,
                 target_block_bytes=64 * 1024, fused_max_block_bytes=0))
    assert jnp.allclose(out4, ref2, atol=1e-5, rtol=1e-5), "ragged-HW-tile mismatch"

    print("KERNEL_OK")
</pallas_src>

<mosaic_0001>
module attributes {stable_mosaic.version = 11 : i64} {
  func.func @_se_fused_kernel(%arg0: i32, %arg1: memref<1x128x256xf32, #tpu.memory_space<vmem>>, %arg2: memref<128x2xf32, #tpu.memory_space<vmem>>, %arg3: memref<1x2xf32, #tpu.memory_space<vmem>>, %arg4: memref<2x128xf32, #tpu.memory_space<vmem>>, %arg5: memref<1x128xf32, #tpu.memory_space<vmem>>, %arg6: memref<1x128x256xf32, #tpu.memory_space<vmem>>) attributes {dimension_semantics = [#tpu.dimension_semantics<parallel>], iteration_bounds = array<i64: 2>, scalar_prefetch = 0 : i64, scratch_operands = 0 : i64, tpu.core_type = #tpu.core_type<tc>, window_params = [{transform_indices = @transform_0, window_bounds = array<i64: 1, 128, 256>}, {pipeline_mode = #tpu.pipeline_mode<synchronous>, transform_indices = @transform_1, window_bounds = array<i64: 128, 2>}, {pipeline_mode = #tpu.pipeline_mode<synchronous>, transform_indices = @transform_2, window_bounds = array<i64: 1, 2>}, {pipeline_mode = #tpu.pipeline_mode<synchronous>, transform_indices = @transform_3, window_bounds = array<i64: 2, 128>}, {pipeline_mode = #tpu.pipeline_mode<synchronous>, transform_indices = @transform_4, window_bounds = array<i64: 1, 128>}, {transform_indices = @transform_5, window_bounds = array<i64: 1, 128, 256>}]} {
    %cst = arith.constant 0.000000e+00 : f32
    %0 = vector.broadcast %cst : f32 to vector<1x128xf32>
    %c0 = arith.constant 0 : index
    %c0_0 = arith.constant 0 : index
    %c0_1 = arith.constant 0 : index
    %1 = vector.load %arg1[%c0, %c0_0, %c0_1] : memref<1x128x256xf32, #tpu.memory_space<vmem>>, vector<1x128x256xf32>
    %cst_2 = arith.constant dense<0.000000e+00> : vector<1x128xf32>
    %2 = vector.multi_reduction <add>, %1, %cst_2 [2] : vector<1x128x256xf32> to vector<1x128xf32>
    %3 = arith.addf %0, %2 : vector<1x128xf32>
    %cst_3 = arith.constant 3.906250e-03 : f32
    %4 = vector.broadcast %cst_3 : f32 to vector<1x128xf32>
    %5 = arith.mulf %3, %4 : vector<1x128xf32>
    %c0_4 = arith.constant 0 : index
    %c0_5 = arith.constant 0 : index
    %6 = vector.load %arg2[%c0_4, %c0_5] : memref<128x2xf32, #tpu.memory_space<vmem>>, vector<128x2xf32>
    %cst_6 = arith.constant dense<0.000000e+00> : vector<1x2xf32>
    %7 = tpu.matmul %5, %6, %cst_6 {dimension_numbers = #tpu.dot_dimension_numbers<[1], [0], [0], [1], [0, 0, 1, 1], [], []>} : vector<1x128xf32>, vector<128x2xf32>, vector<1x2xf32> -> vector<1x2xf32>
    %c0_7 = arith.constant 0 : index
    %c0_8 = arith.constant 0 : index
    %8 = vector.load %arg3[%c0_7, %c0_8] : memref<1x2xf32, #tpu.memory_space<vmem>>, vector<1x2xf32>
    %9 = arith.addf %7, %8 : vector<1x2xf32>
    %cst_9 = arith.constant 0.000000e+00 : f32
    %10 = vector.broadcast %cst_9 : f32 to vector<1x2xf32>
    %11 = arith.maximumf %9, %10 : vector<1x2xf32>
    %c0_10 = arith.constant 0 : index
    %c0_11 = arith.constant 0 : index
    %12 = vector.load %arg4[%c0_10, %c0_11] : memref<2x128xf32, #tpu.memory_space<vmem>>, vector<2x128xf32>
    %cst_12 = arith.constant dense<0.000000e+00> : vector<1x128xf32>
    %13 = tpu.matmul %11, %12, %cst_12 {dimension_numbers = #tpu.dot_dimension_numbers<[1], [0], [0], [1], [0, 0, 1, 1], [], []>} : vector<1x2xf32>, vector<2x128xf32>, vector<1x128xf32> -> vector<1x128xf32>
    %c0_13 = arith.constant 0 : index
    %c0_14 = arith.constant 0 : index
    %14 = vector.load %arg5[%c0_13, %c0_14] : memref<1x128xf32, #tpu.memory_space<vmem>>, vector<1x128xf32>
    %15 = arith.addf %13, %14 : vector<1x128xf32>
    %16 = arith.negf %15 : vector<1x128xf32>
    %17 = math.exp %16 : vector<1x128xf32>
    %cst_15 = arith.constant 1.000000e+00 : f32
    %18 = vector.broadcast %cst_15 : f32 to vector<1x128xf32>
    %19 = arith.addf %18, %17 : vector<1x128xf32>
    %20 = arith.divf %18, %19 : vector<1x128xf32>
    %c0_16 = arith.constant 0 : index
    %c0_17 = arith.constant 0 : index
    %c0_18 = arith.constant 0 : index
    %21 = vector.load %arg1[%c0_16, %c0_17, %c0_18] : memref<1x128x256xf32, #tpu.memory_space<vmem>>, vector<1x128x256xf32>
    %22 = vector.shape_cast %20 : vector<1x128xf32> to vector<1x128x1xf32>
    %23 = vector.broadcast %22 : vector<1x128x1xf32> to vector<1x128x256xf32>
    %24 = arith.mulf %21, %23 : vector<1x128x256xf32>
    %c0_19 = arith.constant 0 : index
    %c0_20 = arith.constant 0 : index
    %c0_21 = arith.constant 0 : index
    %25 = vector.load %arg6[%c0_19, %c0_20, %c0_21] : memref<1x128x256xf32, #tpu.memory_space<vmem>>, vector<1x128x256xf32>
    tpu.vector_store %arg6[%c0_19, %c0_20, %c0_21], %24 {strides = array<i32>} : memref<1x128x256xf32, #tpu.memory_space<vmem>>, vector<1x128x256xf32>,
    return
  }
  func.func @transform_0(%arg0: i32) -> (i32, i32, i32) {
    %c0_i32 = arith.constant 0 : i32
    %c0_i32_0 = arith.constant 0 : i32
    %c0_i32_1 = arith.constant 0 : i32
    return %arg0, %c0_i32, %c0_i32_0 : i32, i32, i32
  }
  func.func @transform_1(%arg0: i32) -> (i32, i32) {
    %c0_i32 = arith.constant 0 : i32
    %c0_i32_0 = arith.constant 0 : i32
    %c0_i32_1 = arith.constant 0 : i32
    return %c0_i32, %c0_i32_0 : i32, i32
  }
  func.func @transform_2(%arg0: i32) -> (i32, i32) {
    %c0_i32 = arith.constant 0 : i32
    %c0_i32_0 = arith.constant 0 : i32
    %c0_i32_1 = arith.constant 0 : i32
    return %c0_i32, %c0_i32_0 : i32, i32
  }
  func.func @transform_3(%arg0: i32) -> (i32, i32) {
    %c0_i32 = arith.constant 0 : i32
    %c0_i32_0 = arith.constant 0 : i32
    %c0_i32_1 = arith.constant 0 : i32
    return %c0_i32, %c0_i32_0 : i32, i32
  }
  func.func @transform_4(%arg0: i32) -> (i32, i32) {
    %c0_i32 = arith.constant 0 : i32
    %c0_i32_0 = arith.constant 0 : i32
    %c0_i32_1 = arith.constant 0 : i32
    return %c0_i32, %c0_i32_0 : i32, i32
  }
  func.func @transform_5(%arg0: i32) -> (i32, i32, i32) {
    %c0_i32 = arith.constant 0 : i32
    %c0_i32_0 = arith.constant 0 : i32
    %c0_i32_1 = arith.constant 0 : i32
    return %arg0, %c0_i32, %c0_i32_0 : i32, i32, i32
  }
}

</mosaic_0001>

<bundles_post_ra>
// kernel: tpu_custom_call.1
= control target key start
LH: loop header
LB: loop body
LE: loop exit
PB: predicated region body
PF: predicated region fallthrough
CT: control target
= control target key end

     0   :  { %10 = vsyncpa [#allocation3], 0  ;;  %s1629_s0 = inlined_call_operand.hbm [shape: f32[2,128,256], index: 0, kind: input, shape index: {}]   ;;  %s1630_s1 = inlined_call_operand.vmem [shape: f32[128,2], index: 1, kind: input, shape index: {}]   ;;  %s1631_s2 = inlined_call_operand.vmem [shape: f32[1,2], index: 2, kind: input, shape index: {}]   ;;  %s1632_s3 = inlined_call_operand.vmem [shape: f32[2,128], index: 3, kind: input, shape index: {}]   ;;  %s1633_s4 = inlined_call_operand.vmem [shape: f32[1,128], index: 4, kind: input, shape index: {}]   ;;  %s1634_s5 = inlined_call_operand.hbm [shape: f32[2,128,256], index: 5, kind: output, shape index: {}]  }
   0x1   :  { %12 = vsyncpa [#allocation3 + $0x1], 0 }
   0x2   :  { %13 = vsyncpa [#allocation4], 0 }
   0x3   :  { %15 = vsyncpa [#allocation4 + $0x1], 0  ;;  %s1171_s18 = smov 0   ;;  %s1173_s19 = smov 0  }
   0x4   :  { %s1175_s20 = smov 0   ;;  %s1177_s21 = smov 0  }
   0x5 LB: > { %s1192_s22 = sadd.s32 4294967295, %s1130_s21   ;;  %s875_s23 = sadd.s32 4294967294, %s1130_s21   ;;  %s1130_s21 = sphi %s1177_s21, %s1647_s21   ;;  %s1126_s20 = sphi %s1175_s20, %s1646_s20   ;;  %s1122_s19 = sphi %s1173_s19, %s1645_s19   ;;  %s1118_s18 = sphi %s1171_s18, %s1644_s18  }
   0x6   : > { %s1196_s24 = sadd.s32 1, %s1130_s21   ;;  %s28_s25 = sadd.s32 1, %s1126_s20 }
   0x7   : > { %s25_s26 = ssub.s32 %s1130_s21, %s1196_s24  ;;  %p35_p0 = scmp.ne.s32.totalorder %s1126_s20, %s1122_s19 }
   0x8   : > { %p26_p1 = scmp.eq.s32.totalorder %s25_s26, 0  ;;  %p36_p2 = scmp.eq.s32.totalorder %s1130_s21, 0 }
   0x9   : > { %p41_p3 = scmp.ne.s32.totalorder %s1122_s19, %s1118_s18  ;;  %p42_p4 = scmp.eq.s32.totalorder %s1192_s22, 0 }
   0xa   : > { %s1208_s27 = scalar_select %p26_p1, %s1126_s20, %s28_s25  }
   0xb   : > { %p1210_p5 = por %p36_p2, %p35_p0  ;;  %p1214_p6 = por %p42_p4, %p41_p3 }
   0xc   : > { %p149_p7 = scmp.eq.s32.totalorder %s1192_s22, 1  ;;  %p155_p8 = scmp.eq.s32.totalorder %s875_s23, 1 }
   0xd   : > { %p989_p10 = scmp.lt.s32.totalorder %s1130_s21, 2  ;;  %s187_s7 = sand.u32 1, %s1126_s20  }
   0xe   : > { %p1221_p11 = por %p149_p7, %p35_p0  ;;  %p1225_p12 = por %p155_p8, %p41_p3 }
   0xf   : > { %s892_s8 = sshll.u32 %s1130_s21, 12  ;;  %s878_s9 = sshll.u32 %s187_s7, 8 }
  0x10   : > { %s1638_s30 = scalar_select %p1221_p11, 1, 0 }
  0x11   : > { %s1639_s6 = scalar_select %p1225_p12, 1, 0 }
  0x12   : > { %s1234_s12 = scalar_lea.hbm %s1629_s0, %s892_s8  ;;  %s191_s13 = scalar_lea.vmem [#allocation2], %s878_s9 }
  0x13   : > { %s198_s14 = sshll.u32 %s191_s13, 4  ;;  %p1238_p13 = pnand %p989_p10, %p1210_p5  ;;  %s1242_s14 = int_to_ptr.vmem [resolvable:$true] %s198_s14 }
  0x14   : > { %s1244_s16 = scalar_lea.sflag [#allocation3], %s187_s7  ;;  %s1034_s17 = scalar_lea.hbm %s1234_s12, 4096 }
  0x15   : > { %p1035_p0 = scmp.ne.s32.totalorder %s1234_s12, %s1034_s17  ;;  %p1036_p1 = pneg %p1238_p13 }
  0x16   : > { %s1039_s26 = scalar_lea.hbm %s1629_s0, 8192  ;;  %p1040_p4 = scmp.lt.u32.totalorder %s1234_s12, %s1629_s0 }
  0x17   : > { %p1037_p2 = pnand %p1036_p1, %p1035_p0  ;;  %p1041_p5 = scmp.lt.u32.totalorder %s1039_s26, %s1034_s17 }
  0x18   : > { %p1043_p8 = scmp.lt.u32.totalorder %s1034_s17, %s1234_s12 }
  0x19   : > { %p1038_p3 = pneg %p1037_p2  ;;  %p1042_p7 = por %p1041_p5, %p1040_p4 }
  0x1b   : > { %p1044_p10 = por %p1043_p8, %p1042_p7 }
  0x1d   : > { %p1045_p9 = pnand %p1044_p10, %p1038_p3 }
  0x1f   : > { %1048 = shalt.err (!%p1045_p9)
}
  0x20   : > { %s1049_s7 = scalar_lea.vmem %s1242_s14, 4096  ;;  %s1132_s9 = smov [#allocation2]  }
  0x21   : > { %p1050_p0 = scmp.ne.s32.totalorder %s1242_s14, %s1049_s7  ;;  %s1054_s10 = sshll.u32 %s1132_s9, 4  ;;  %s1055_s10 = int_to_ptr.vmem [resolvable:$false] %s1054_s10 }
  0x22   : > { %s1056_s11 = scalar_lea.vmem %s1055_s10, 8192  ;;  %p1057_p11 = scmp.lt.s32.totalorder %s1242_s14, %s1055_s10 }
  0x23   : > { %p1052_p2 = pnand %p1050_p0, %p1036_p1  ;;  %p1058_p4 = scmp.lt.s32.totalorder %s1056_s11, %s1049_s7 }
  0x25   : > { %p1053_p12 = pneg %p1052_p2  ;;  %p1059_p5 = por %p1058_p4, %p1057_p11 }
  0x27   : > { %p1060_p7 = pnand %p1059_p5, %p1053_p12 }
  0x29   : > { %1063 = shalt.err (!%p1060_p7)
}
  0x2a   : > { %s1133_s13 = smov 256   ;;  %s1134_s17 = smov 16  }
  0x2b   : > { %984 = dma.hbm_to_vmem [thread:$0]  (!%p1238_p13), %s1234_s12, 4096, %s1242_s14, %s1244_s16, %s1133_s13, %s1133_s13, %s1134_s17  }
  0x2c   : > { %p881_p9 = scmp.ge.s32.totalorder %s1130_s21, 1  ;;  %p206_p1 = scmp.lt.s32.totalorder %s1130_s21, 3 }
  0x2e   : > { %p207_p3 = pnand %p881_p9, %p206_p1 }
  0x2f   : > { %s1275_s23 = sand.u32 (!%p207_p3), 1, %s1122_s19  }
  0x30   : > { %210 = sbr.rel (%p207_p3) target bundleno = 857 (0x359), region = 40  ;;  %s882_s25 = sshll.u32 (!%p207_p3), %s1275_s23, 8 }
  0x31   : > { %s213_s26 = scalar_lea.sflag (!%p207_p3), [#allocation3], %s1275_s23  ;;  %s1281_s28 = scalar_lea.vmem (!%p207_p3), [#allocation2], %s882_s25 }
  0x37   : > { %1109 = dma.done.wait (%p1214_p6), %s213_s26, 4096  }
  0x38   : > { %1111 = vsyncadd (%p1214_p6), %s213_s26, 4294963200  ;;  %v1288_v0 = vld [vmem:[%s1281_s28] sm:$0xff]  ;;  %v1291_v1 = vld [vmem:[%s1281_s28 + $0x8] sm:$0xff]  ;;  %v1135_v38 = vmov 0.0|0.0   ;;  %vm1136_vm0 = vmmov 0   ;;  %vm399_vm1 = vcmask 130112  }
  0x39   : > { %v1294_v2 = vld [vmem:[%s1281_s28 + $0x20] sm:$0xff]  ;;  %v275_v3 = vadd.f32 %v1291_v1, %v1288_v0  ;;  %v1299_v4 = vld [vmem:[%s1281_s28 + $0x28] sm:$0xff]  ;;  %v1302_v5 = vld [vmem:[%s1281_s28 + $0x10] sm:$0xff]  ;;  %953 = vmatprep.subr.bf16.mxu0 %v1135_v38  ;;  %vm406_vm2 = vcmask 195712   ;;  %vm413_vm3 = vcmask 261312   ;;  %vm420_vm4 = vcmask 326912  }
  0x3a   : > { %v1305_v6 = vld [vmem:[%s1281_s28 + $0x18] sm:$0xff]  ;;  %v281_v7 = vadd.f32 %v1299_v4, %v1294_v2  ;;  %v1310_v8 = vld [vmem:[%s1281_s28 + $0x30] sm:$0xff]  ;;  %v1320_v12 = vld [vmem:[%s1281_s28 + $0x40] sm:$0xff]  ;;  %vm427_vm5 = vcmask 392512   ;;  %vm434_vm6 = vcmask 458112   ;;  %vm441_vm7 = vcmask 523712  }
  0x3b   : > { %v1313_v9 = vld [vmem:[%s1281_s28 + $0x38] sm:$0xff]  ;;  %276 = vadd.xlane.f32.xlu0 %v275_v3  ;;  %v278_v10 = vadd.f32 %v1305_v6, %v1302_v5  ;;  %v1323_v13 = vld [vmem:[%s1281_s28 + $0x48] sm:$0xff]  ;;  %v1326_v14 = vld [vmem:[%s1281_s28 + $0x50] sm:$0xff]  ;;  %vm448_vm8 = vcmask 589312   ;;  %vm455_vm9 = vcmask 654912   ;;  %vm462_vm10 = vcmask 720512  }
  0x3c   : > { %282 = vadd.xlane.f32.xlu1 %v281_v7  ;;  %v284_v11 = vadd.f32 %v1313_v9, %v1310_v8  ;;  %v1329_v15 = vld [vmem:[%s1281_s28 + $0x58] sm:$0xff]  ;;  %v287_v16 = vadd.f32 %v1323_v13, %v1320_v12  ;;  %v1336_v18 = vld [vmem:[%s1281_s28 + $0x60] sm:$0xff]  ;;  %v1339_v19 = vld [vmem:[%s1281_s28 + $0x68] sm:$0xff]  ;;  %vm469_vm11 = vcmask 786112   ;;  %vm476_vm12 = vcmask 851712   ;;  %s1516_s13 = scalar_lea.vmem [#allocation5], %s882_s25 }
  0x3d   : > { %v290_v17 = vadd.f32 %v1329_v15, %v1326_v14  ;;  %v1342_v20 = vld [vmem:[%s1281_s28 + $0x70] sm:$0xff]  ;;  %v1345_v21 = vld [vmem:[%s1281_s28 + $0x78] sm:$0xff]  ;;  %v293_v22 = vadd.f32 %v1339_v19, %v1336_v18  ;;  %v1352_v24 = vld [vmem:[%s1281_s28 + $0x80] sm:$0xff]  ;;  %vm483_vm13 = vcmask 917312   ;;  %vm490_vm14 = vcmask 982912   ;;  %s893_s25 = sshll.u32 %s1192_s22, 12 }
  0x3e   : > { %v296_v23 = vadd.f32 %v1345_v21, %v1342_v20  ;;  %v1355_v25 = vld [vmem:[%s1281_s28 + $0x88] sm:$0xff]  ;;  %v1358_v26 = vld [vmem:[%s1281_s28 + $0x90] sm:$0xff]  ;;  %v1361_v27 = vld [vmem:[%s1281_s28 + $0x98] sm:$0xff]  ;;  %vm497_vm15 = vcmask 1048512   ;;  %s802_s17 = sshll.u32 %s1516_s13, 4  ;;  %s1579_s29 = scalar_lea.hbm %s1634_s5, %s893_s25  ;;  %s1581_s17 = int_to_ptr.vmem [resolvable:$true] %s802_s17 }
  0x3f   : > { %279 = vadd.xlane.f32.xlu0 %v278_v10  ;;  %v299_v28 = vadd.f32 %v1355_v25, %v1352_v24  ;;  %v302_v29 = vadd.f32 %v1361_v27, %v1358_v26  ;;  %v1368_v30 = vld [vmem:[%s1281_s28 + $0xa0] sm:$0xff]  ;;  %v1371_v31 = vld [vmem:[%s1281_s28 + $0xa8] sm:$0xff]  ;;  %v1374_v32 = vld [vmem:[%s1281_s28 + $0xb0] sm:$0xff]  ;;  %s789_s22 = scalar_lea.sflag [#allocation4], %s1275_s23  ;;  %s1064_s12 = scalar_lea.vmem %s1581_s17, 4096 }
  0x40   : > { %285 = vadd.xlane.f32.xlu1 %v284_v11  ;;  %v1377_v33 = vld [vmem:[%s1281_s28 + $0xb8] sm:$0xff]  ;;  %v355_v34 = vld [vmem:[%s1630_s1] sm:$0xff]  ;;  %v356_v35 = vld [vmem:[%s1630_s1 + $0x8] sm:$0xff]  ;;  %v305_v37 = vadd.f32 %v1371_v31, %v1368_v30  ;;  %p1065_p6 = scmp.ne.s32.totalorder %s1581_s17, %s1064_s12  ;;  %p1641_p11 = scmp.ne.s32.totalorder %s1638_s30, 0 }
  0x41   : > { %v954_v36 = vpack.c.bf16 %v356_v35, %v355_v34  ;;  %v308_v39 = vadd.f32 %v1377_v33, %v1374_v32  ;;  %v1390_v40 = vld [vmem:[%s1281_s28 + $0xc0] sm:$0xff]  ;;  %v1393_v41 = vld [vmem:[%s1281_s28 + $0xc8] sm:$0xff]  ;;  %v1396_v42 = vld [vmem:[%s1281_s28 + $0xd0] sm:$0xff]  ;;  %v388_v34 = vlaneseq  ;;  %s1138_s14 = smov [#allocation5]  }
  0x42   : > { %v1399_v43 = vld [vmem:[%s1281_s28 + $0xd8] sm:$0xff]  ;;  %v357_v44 = vld [vmem:[%s1630_s1 + $0x10] sm:$0xff]  ;;  %v311_v47 = vadd.f32 %v1393_v41, %v1390_v40  ;;  %v1412_v49 = vld [vmem:[%s1281_s28 + $0xe0] sm:$0xff]  ;;  %p1066_p12 = pnand %p1065_p6, %p1641_p11  ;;  %s1068_s15 = sshll.u32 %s1138_s14, 4  ;;  %s1069_s15 = int_to_ptr.vmem [resolvable:$false] %s1068_s15 }
  0x43   : > { %288 = vadd.xlane.f32.xlu0 %v287_v16  ;;  %955 = vmatpush3.bf16.msra.mxu0 %v954_v36  ;;  %v358_v45 = vld [vmem:[%s1630_s1 + $0x18] sm:$0xff]  ;;  %v314_v48 = vadd.f32 %v1399_v43, %v1396_v42  ;;  %v1415_v50 = vld [vmem:[%s1281_s28 + $0xe8] sm:$0xff]  ;;  %v1418_v51 = vld [vmem:[%s1281_s28 + $0xf0] sm:$0xff]  ;;  %v1463_v35 = vand.u32 127, %v388_v34  ;;  %v1465_v36 = vshrl.u32 %v388_v34, 7  ;;  %s1070_s16 = scalar_lea.vmem %s1069_s15, 8192  ;;  %p1071_p8 = scmp.lt.s32.totalorder %s1581_s17, %s1069_s15 }
  0x44   : > { %291 = vadd.xlane.f32.xlu1 %v290_v17  ;;  %956 = vmatprep.subr.bf16.mxu0 %v1135_v38  ;;  %v957_v46 = vpack.c.bf16 %v358_v45, %v357_v44  ;;  %v1421_v52 = vld [vmem:[%s1281_s28 + $0xf8] sm:$0xff]  ;;  %v359_v53 = vld [vmem:[%s1630_s1 + $0x20] sm:$0xff]  ;;  %v360_v54 = vld [vmem:[%s1630_s1 + $0x28] sm:$0xff]  ;;  %v317_v56 = vadd.f32 %v1415_v50, %v1412_v49  ;;  %p1067_p13 = pneg %p1066_p12  ;;  %p1072_p10 = scmp.lt.s32.totalorder %s1070_s16, %s1064_s12 }
  0x45   : > { %v960_v55 = vpack.c.bf16 %v360_v54, %v359_v53  ;;  %v320_v57 = vadd.f32 %v1421_v52, %v1418_v51  ;;  %v361_v58 = vld [vmem:[%s1630_s1 + $0x30] sm:$0xff]  ;;  %v362_v59 = vld [vmem:[%s1630_s1 + $0x38] sm:$0xff]  ;;  %v363_v61 = vld [vmem:[%s1630_s1 + $0x40] sm:$0xff]  ;;  %v408_v44 = vadd.s32 4294967272, %v1463_v35  ;;  %v415_v53 = vadd.s32 4294967264, %v1463_v35 }
  0x46   : > { %v963_v60 = vpack.c.bf16 %v362_v59, %v361_v58  ;;  %v364_v62 = vld [vmem:[%s1630_s1 + $0x48] sm:$0xff]  ;;  %v365_v3 = vld [vmem:[%s1630_s1 + $0x50] sm:$0xff]  ;;  %v366_v7 = vld [vmem:[%s1630_s1 + $0x58] sm:$0xff]  ;;  %v422_v58 = vadd.s32 4294967256, %v1463_v35  ;;  %p1073_p0 = por %p1072_p10, %p1071_p8 }
  0x47   : > { %294 = vadd.xlane.f32.xlu0 %v293_v22  ;;  %958 = vmatpush3.bf16.msra.mxu0 %v957_v46  ;;  %v966_v63 = vpack.c.bf16 %v364_v62, %v363_v61  ;;  %v969_v10 = vpack.c.bf16 %v366_v7, %v365_v3  ;;  %v367_v11 = vld [vmem:[%s1630_s1 + $0x60] sm:$0xff]  ;;  %v368_v16 = vld [vmem:[%s1630_s1 + $0x68] sm:$0xff]  ;;  %v369_v22 = vld [vmem:[%s1630_s1 + $0x70] sm:$0xff]  ;;  %v392_v46 = vsub.s32 %v1463_v35, %v1465_v36  ;;  %v429_v7 = vadd.s32 4294967248, %v1463_v35 }
  0x48   : > { %297 = vadd.xlane.f32.xlu1 %v296_v23  ;;  %959 = vmatprep.subr.bf16.mxu0 %v1135_v38  ;;  %v972_v17 = vpack.c.bf16 %v368_v16, %v367_v11  ;;  %v370_v23 = vld [vmem:[%s1630_s1 + $0x78] sm:$0xff]  ;;  %v418_v3 = vsub.s32 %v415_v53, %v1465_v36  ;;  %v450_v53 = vadd.s32 4294967224, %v1463_v35  ;;  %p1074_p2 = pnand %p1073_p0, %p1067_p13 }
  0x4b   : > { %300 = vadd.xlane.f32.xlu0 %v299_v28  ;;  %961 = vmatpush3.bf16.msra.mxu0 %v960_v55  ;;  %v975_v28 = vpack.c.bf16 %v370_v23, %v369_v22  ;;  %v436_v22 = vadd.s32 4294967240, %v1463_v35 }
  0x4c   : > { %303 = vadd.xlane.f32.xlu1 %v302_v29  ;;  %962 = vmatprep.subr.bf16.mxu0 %v1135_v38  ;;  %v1137_v29 = vmov 0.0  }
  0x4d   : > { %945 = vmatprep.mubr.msk.f32.mxu0 %vm1136_vm0, %v1137_v29  ;;  %948 = vmatprep.subr.mxu1 %v1137_v29 }
  0x4e   : > { %950 = vmatprep.mubr.msk.f32.mxu1 %vm1136_vm0, %v1137_v29  ;;  %vm577_vm0 = vcmask 1041408  }
  0x4f   : > { %306 = vadd.xlane.f32.xlu0 %v305_v37  ;;  %964 = vmatpush3.bf16.msra.mxu0 %v963_v60  ;;  %v394_v37 = vadd.s32 4294967288, %v1463_v35 }
  0x50   : > { %309 = vadd.xlane.f32.xlu1 %v308_v39  ;;  %965 = vmatprep.subr.bf16.mxu0 %v1135_v38  ;;  %v401_v39 = vadd.s32 4294967280, %v1463_v35 }
  0x52   : > { %v404_v54 = vsub.s32 %v401_v39, %v1465_v36 }
  0x53   : > { %312 = vadd.xlane.f32.xlu0 %v311_v47  ;;  %967 = vmatpush3.bf16.msra.mxu0 %v966_v63 }
  0x54   : > { %315 = vadd.xlane.f32.xlu1 %v314_v48  ;;  %968 = vmatprep.subr.bf16.mxu0 %v1135_v38  ;;  %v397_v48 = vsub.s32 %v394_v37, %v1465_v36 }
  0x57   : > { %318 = vadd.xlane.f32.xlu0 %v317_v56  ;;  %970 = vmatpush3.bf16.msra.mxu0 %v969_v10 }
  0x58   : > { %321 = vadd.xlane.f32.xlu1 %v320_v57  ;;  %971 = vmatprep.subr.bf16.mxu0 %v1135_v38  ;;  %v411_v57 = vsub.s32 %v408_v44, %v1465_v36  ;;  %v432_v44 = vsub.s32 %v429_v7, %v1465_v36  ;;  %v464_v7 = vadd.s32 4294967208, %v1463_v35 }
  0x5b   : > { %973 = vmatpush3.bf16.msra.mxu0 %v972_v17  ;;  %v425_v17 = vsub.s32 %v422_v58, %v1465_v36 }
  0x5c   : > { %974 = vmatprep.subr.bf16.mxu0 %v1135_v38 }
  0x5f   : > { %976 = vmatpush3.bf16.msra.mxu0 %v975_v28 }
  0xc8   : > { %v277_v38 = vpop.xlane.xlu0 %276 }
  0xc9   : > { %v283_v45 = vpop.xlane.xlu1 %282  ;;  %v339_v47 = vmul.f32 0.00390625, %v277_v38 }
  0xca   : > { %v341_v55 = vmul.f32 0.00390625, %v283_v45  ;;  %v443_v45 = vadd.s32 4294967232, %v1463_v35 }
  0xcb   : > { %v393_v62 = vrot.slane %v339_v47, %v392_v46 }
  0xcc   : > { %v280_v56 = vpop.xlane.xlu0 %279  ;;  %v405_v10 = vrot.slane %v341_v55, %v404_v54 }
  0xcd   : > { %v340_v59 = vmul.f32 0.00390625, %v280_v56  ;;  %v286_v60 = vpop.xlane.xlu1 %285 }
  0xce   : > { %v342_v61 = vmul.f32 0.00390625, %v286_v60  ;;  %v457_v60 = vadd.s32 4294967216, %v1463_v35 }
  0xcf   : > { %v398_v63 = vrot.slane %v340_v59, %v397_v48  ;;  %v439_v48 = vsub.s32 %v436_v22, %v1465_v36  ;;  %v446_v59 = vsub.s32 %v443_v45, %v1465_v36 }
  0xd0   : > { %v412_v11 = vrot.slane %v342_v61, %v411_v57  ;;  %v289_v16 = vpop.xlane.xlu0 %288 }
  0xd1   : > { %v400_v23 = vsel %vm399_vm1, %v398_v63, %v393_v62  ;;  %v343_v28 = vmul.f32 0.00390625, %v289_v16  ;;  %v292_v29 = vpop.xlane.xlu1 %291  ;;  %vm573_vm1 = vcmask 15360  }
  0xd2   : > { %v407_v34 = vsel %vm406_vm2, %v405_v10, %v400_v23  ;;  %v344_v37 = vmul.f32 0.00390625, %v292_v29  ;;  %v460_v23 = vsub.s32 %v457_v60, %v1465_v36 }
  0xd3   : > { %v414_v38 = vsel %vm413_vm3, %v412_v11, %v407_v34  ;;  %v419_v39 = vrot.slane %v343_v28, %v418_v3  ;;  %v453_v3 = vsub.s32 %v450_v53, %v1465_v36  ;;  %v471_v28 = vadd.s32 4294967200, %v1463_v35 }
  0xd4   : > { %v426_v46 = vrot.slane %v344_v37, %v425_v17  ;;  %v295_v47 = vpop.xlane.xlu0 %294 }
  0xd5   : > { %v421_v54 = vsel %vm420_vm4, %v419_v39, %v414_v38  ;;  %v345_v55 = vmul.f32 0.00390625, %v295_v47  ;;  %v298_v56 = vpop.xlane.xlu1 %297  ;;  %v467_v38 = vsub.s32 %v464_v7, %v1465_v36  ;;  %v478_v39 = vadd.s32 4294967192, %v1463_v35 }
  0xd6   : > { %v346_v57 = vmul.f32 0.00390625, %v298_v56  ;;  %v428_v61 = vsel %vm427_vm5, %v426_v46, %v421_v54  ;;  %v474_v53 = vsub.s32 %v471_v28, %v1465_v36  ;;  %v485_v54 = vadd.s32 4294967184, %v1463_v35 }
  0xd7   : > { %v433_v58 = vrot.slane %v345_v55, %v432_v44 }
  0xd8   : > { %v440_v62 = vrot.slane %v346_v57, %v439_v48  ;;  %v301_v63 = vpop.xlane.xlu0 %300  ;;  %v488_v7 = vsub.s32 %v485_v54, %v1465_v36  ;;  %v572_v54 = vld [vmem:[%s1633_s4] sm:$0x1] }
  0xd9   : > { %v435_v10 = vsel %vm434_vm6, %v433_v58, %v428_v61  ;;  %v347_v11 = vmul.f32 0.00390625, %v301_v63  ;;  %v304_v16 = vpop.xlane.xlu1 %303  ;;  %v481_v58 = vsub.s32 %v478_v39, %v1465_v36 }
  0xda   : > { %v348_v17 = vmul.f32 0.00390625, %v304_v16  ;;  %v442_v29 = vsel %vm441_vm7, %v440_v62, %v435_v10 }
  0xdb   : > { %v447_v22 = vrot.slane %v347_v11, %v446_v59  ;;  %v492_v59 = vadd.s32 4294967176, %v1463_v35 }
  0xdc   : > { %v454_v34 = vrot.slane %v348_v17, %v453_v3  ;;  %v307_v37 = vpop.xlane.xlu0 %306 }
  0xdd   : > { %v449_v44 = vsel %vm448_vm8, %v447_v22, %v442_v29  ;;  %v349_v45 = vmul.f32 0.00390625, %v307_v37  ;;  %v310_v46 = vpop.xlane.xlu1 %309  ;;  %v495_v17 = vsub.s32 %v492_v59, %v1465_v36 }
  0xde   : > { %v350_v47 = vmul.f32 0.00390625, %v310_v46  ;;  %v456_v55 = vsel %vm455_vm9, %v454_v34, %v449_v44  ;;  %v571_v44 = vld [vmem:[%s1632_s3] sm:$0x3] }
  0xdf   : > { %v461_v48 = vrot.slane %v349_v45, %v460_v23  ;;  %949 = vmatpush3.msk.msra.mxu1 %vm577_vm0, %v571_v44  ;;  %v371_v45 = vld [vmem:[%s1631_s2] sm:$0x1] }
  0xe0   : > { %v468_v56 = vrot.slane %v350_v47, %v467_v38  ;;  %v313_v57 = vpop.xlane.xlu0 %312 }
  0xe1   : > { %v463_v60 = vsel %vm462_vm10, %v461_v48, %v456_v55  ;;  %v351_v61 = vmul.f32 0.00390625, %v313_v57  ;;  %v316_v62 = vpop.xlane.xlu1 %315 }
  0xe2   : > { %v352_v63 = vmul.f32 0.00390625, %v316_v62  ;;  %v470_v10 = vsel %vm469_vm11, %v468_v56, %v463_v60 }
  0xe3   : > { %v475_v3 = vrot.slane %v351_v61, %v474_v53  ;;  %v659_v61 = vsub.s32 0, %v1465_v36 }
  0xe4   : > { %v482_v11 = vrot.slane %v352_v63, %v481_v58  ;;  %v319_v16 = vpop.xlane.xlu0 %318 }
  0xe5   : > { %v477_v22 = vsel %vm476_vm12, %v475_v3, %v470_v10  ;;  %v353_v23 = vmul.f32 0.00390625, %v319_v16  ;;  %v322_v28 = vpop.xlane.xlu1 %321 }
  0xe6   : > { %v354_v29 = vmul.f32 0.00390625, %v322_v28  ;;  %v484_v37 = vsel %vm483_vm13, %v482_v11, %v477_v22 }
  0xe7   : > { %v489_v35 = vrot.slane %v353_v23, %v488_v7 }
  0xe8   : > { %v496_v34 = vrot.slane %v354_v29, %v495_v17 }
  0xe9   : > { %v491_v38 = vsel %vm490_vm14, %v489_v35, %v484_v37 }
  0xea   : > { %v498_v39 = vsel %vm497_vm15, %v496_v34, %v491_v38 }
  0xeb   : > { %946 = vmatmul.mubr.f32.vlgmr.msra.gmra.mrb[0].mxu0 %v498_v39 }
 0x1be   : > { %v566_v46 = vpop.f32.mrb[0].mxu0 }
 0x1bf   : > { %v567_v47 = vadd.f32 %v566_v46, %v371_v45  ;;  %v947_v48 = vpop.f32.mrb[1].mxu0 }
 0x1c1   : > { %v570_v53 = vmax.f32 %v567_v47, 0.0 }
 0x1c3   : > { %951 = vmatmul.mubr.msk.f32.vlgmr.msra.gmra.mrb[0].mxu1 %vm573_vm1, %v570_v53 }
 0x296   : > { %v647_v55 = vpop.f32.mrb[0].mxu1 }
 0x297   : > { %v648_v56 = vadd.f32 %v647_v55, %v572_v54  ;;  %v952_v57 = vpop.f32.mrb[1].mxu1 }
 0x299   : > { %v886_v58 = vmul.f32 -1.442695, %v648_v56 }
 0x29b   : > { %1030 = vpow2.f32 %v886_v58 }
 0x2a5   : > { %v1031_v59 = vpop.eup %1030 }
 0x2a6   : > { %v654_v60 = vadd.f32 1.0, %v1031_v59 }
 0x2a8   : > { %1032 = vrcp.f32 %v654_v60 }
 0x2b2   : > { %v1033_v62 = vpop.eup %1032 }
 0x2b3   : > { %v660_v63 = vrot.slane %v1033_v62, %v659_v61 }
 0x2b5   : > { %666 = vbcast.lane.b32.xlu1 %v660_v63, 264  ;;  %662 = vbcast.lane.b32.xlu0 %v660_v63, 256 }
 0x2b9   : > { %670 = vbcast.lane.b32.xlu1 %v660_v63, 272  ;;  %678 = vbcast.lane.b32.xlu0 %v660_v63, 288 }
 0x2bd   : > { %674 = vbcast.lane.b32.xlu1 %v660_v63, 280  ;;  %686 = vbcast.lane.b32.xlu0 %v660_v63, 304 }
 0x2c1   : > { %682 = vbcast.lane.b32.xlu1 %v660_v63, 296  ;;  %694 = vbcast.lane.b32.xlu0 %v660_v63, 320 }
 0x2c5   : > { %690 = vbcast.lane.b32.xlu1 %v660_v63, 312  ;;  %702 = vbcast.lane.b32.xlu0 %v660_v63, 336 }
 0x2c9   : > { %698 = vbcast.lane.b32.xlu1 %v660_v63, 328  ;;  %710 = vbcast.lane.b32.xlu0 %v660_v63, 352 }
 0x2cd   : > { %706 = vbcast.lane.b32.xlu1 %v660_v63, 344  ;;  %718 = vbcast.lane.b32.xlu0 %v660_v63, 368 }
 0x2d1   : > { %714 = vbcast.lane.b32.xlu1 %v660_v63, 360 }
 0x2d5   : > { %722 = vbcast.lane.b32.xlu1 %v660_v63, 376 }
 0x327   : > { %v667_v36 = vpop.permute.xlu1 %666  ;;  %v663_v3 = vpop.permute.xlu0 %662 }
 0x328   : > { %v726_v7 = vmul.f32 %v667_v36, %v1302_v5  ;;  %v727_v10 = vmul.f32 %v667_v36, %v1305_v6  ;;  %v724_v11 = vmul.f32 %v663_v3, %v1288_v0  ;;  %v725_v16 = vmul.f32 %v663_v3, %v1291_v1 }
 0x32a   : > { %758 = vst [vmem:[%s1516_s13 + $0x10] sm:$0xff] %v726_v7  ;;  %759 = vst [vmem:[%s1516_s13 + $0x18] sm:$0xff] %v727_v10 }
 0x32b   : > { %756 = vst [vmem:[%s1516_s13] sm:$0xff] %v724_v11  ;;  %757 = vst [vmem:[%s1516_s13 + $0x8] sm:$0xff] %v725_v16  ;;  %v671_v5 = vpop.permute.xlu1 %670  ;;  %v679_v0 = vpop.permute.xlu0 %678 }
 0x32c   : > { %v728_v1 = vmul.f32 %v671_v5, %v1294_v2  ;;  %v729_v6 = vmul.f32 %v671_v5, %v1299_v4  ;;  %v732_v17 = vmul.f32 %v679_v0, %v1320_v12  ;;  %v733_v22 = vmul.f32 %v679_v0, %v1323_v13 }
 0x32e   : > { %760 = vst [vmem:[%s1516_s13 + $0x20] sm:$0xff] %v728_v1  ;;  %761 = vst [vmem:[%s1516_s13 + $0x28] sm:$0xff] %v729_v6 }
 0x32f   : > { %764 = vst [vmem:[%s1516_s13 + $0x40] sm:$0xff] %v732_v17  ;;  %765 = vst [vmem:[%s1516_s13 + $0x48] sm:$0xff] %v733_v22  ;;  %v675_v23 = vpop.permute.xlu1 %674  ;;  %v687_v28 = vpop.permute.xlu0 %686 }
 0x330   : > { %v730_v29 = vmul.f32 %v675_v23, %v1310_v8  ;;  %v731_v2 = vmul.f32 %v675_v23, %v1313_v9  ;;  %v736_v4 = vmul.f32 %v687_v28, %v1336_v18  ;;  %v737_v12 = vmul.f32 %v687_v28, %v1339_v19 }
 0x332   : > { %762 = vst [vmem:[%s1516_s13 + $0x30] sm:$0xff] %v730_v29  ;;  %763 = vst [vmem:[%s1516_s13 + $0x38] sm:$0xff] %v731_v2 }
 0x333   : > { %768 = vst [vmem:[%s1516_s13 + $0x60] sm:$0xff] %v736_v4  ;;  %769 = vst [vmem:[%s1516_s13 + $0x68] sm:$0xff] %v737_v12  ;;  %v683_v13 = vpop.permute.xlu1 %682  ;;  %v695_v35 = vpop.permute.xlu0 %694 }
 0x334   : > { %v734_v34 = vmul.f32 %v683_v13, %v1326_v14  ;;  %v735_v8 = vmul.f32 %v683_v13, %v1329_v15  ;;  %v740_v9 = vmul.f32 %v695_v35, %v1352_v24  ;;  %v741_v18 = vmul.f32 %v695_v35, %v1355_v25 }
 0x336   : > { %766 = vst [vmem:[%s1516_s13 + $0x50] sm:$0xff] %v734_v34  ;;  %767 = vst [vmem:[%s1516_s13 + $0x58] sm:$0xff] %v735_v8 }
 0x337   : > { %772 = vst [vmem:[%s1516_s13 + $0x80] sm:$0xff] %v740_v9  ;;  %773 = vst [vmem:[%s1516_s13 + $0x88] sm:$0xff] %v741_v18  ;;  %v691_v19 = vpop.permute.xlu1 %690  ;;  %v703_v37 = vpop.permute.xlu0 %702 }
 0x338   : > { %v738_v38 = vmul.f32 %v691_v19, %v1342_v20  ;;  %v739_v14 = vmul.f32 %v691_v19, %v1345_v21  ;;  %v744_v15 = vmul.f32 %v703_v37, %v1368_v30  ;;  %v745_v24 = vmul.f32 %v703_v37, %v1371_v31 }
 0x33a   : > { %770 = vst [vmem:[%s1516_s13 + $0x70] sm:$0xff] %v738_v38  ;;  %771 = vst [vmem:[%s1516_s13 + $0x78] sm:$0xff] %v739_v14 }
 0x33b   : > { %776 = vst [vmem:[%s1516_s13 + $0xa0] sm:$0xff] %v744_v15  ;;  %777 = vst [vmem:[%s1516_s13 + $0xa8] sm:$0xff] %v745_v24  ;;  %v699_v25 = vpop.permute.xlu1 %698  ;;  %v711_v39 = vpop.permute.xlu0 %710 }
 0x33c   : > { %v742_v44 = vmul.f32 %v699_v25, %v1358_v26  ;;  %v743_v20 = vmul.f32 %v699_v25, %v1361_v27  ;;  %v748_v21 = vmul.f32 %v711_v39, %v1390_v40  ;;  %v749_v30 = vmul.f32 %v711_v39, %v1393_v41 }
 0x33e   : > { %774 = vst [vmem:[%s1516_s13 + $0x90] sm:$0xff] %v742_v44  ;;  %775 = vst [vmem:[%s1516_s13 + $0x98] sm:$0xff] %v743_v20 }
 0x33f   : > { %780 = vst [vmem:[%s1516_s13 + $0xc0] sm:$0xff] %v748_v21  ;;  %781 = vst [vmem:[%s1516_s13 + $0xc8] sm:$0xff] %v749_v30  ;;  %v707_v31 = vpop.permute.xlu1 %706  ;;  %v719_v45 = vpop.permute.xlu0 %718 }
 0x340   : > { %v746_v26 = vmul.f32 %v707_v31, %v1374_v32  ;;  %v747_v46 = vmul.f32 %v707_v31, %v1377_v33  ;;  %v752_v27 = vmul.f32 %v719_v45, %v1412_v49  ;;  %v753_v40 = vmul.f32 %v719_v45, %v1415_v50 }
 0x342   : > { %778 = vst [vmem:[%s1516_s13 + $0xb0] sm:$0xff] %v746_v26  ;;  %779 = vst [vmem:[%s1516_s13 + $0xb8] sm:$0xff] %v747_v46 }
 0x343   : > { %784 = vst [vmem:[%s1516_s13 + $0xe0] sm:$0xff] %v752_v27  ;;  %785 = vst [vmem:[%s1516_s13 + $0xe8] sm:$0xff] %v753_v40  ;;  %v715_v41 = vpop.permute.xlu1 %714 }
 0x344   : > { %v750_v47 = vmul.f32 %v715_v41, %v1396_v42  ;;  %v751_v48 = vmul.f32 %v715_v41, %v1399_v43 }
 0x346   : > { %782 = vst [vmem:[%s1516_s13 + $0xd0] sm:$0xff] %v750_v47  ;;  %783 = vst [vmem:[%s1516_s13 + $0xd8] sm:$0xff] %v751_v48 }
 0x347   : > { %v723_v32 = vpop.permute.xlu1 %722 }
 0x348   : > { %v754_v33 = vmul.f32 %v723_v32, %v1418_v51  ;;  %v755_v42 = vmul.f32 %v723_v32, %v1421_v52 }
 0x34a   : > { %786 = vst [vmem:[%s1516_s13 + $0xf0] sm:$0xff] %v754_v33  ;;  %787 = vst [vmem:[%s1516_s13 + $0xf8] sm:$0xff] %v755_v42 }
 0x34b   : > { %1077 = shalt.err (!%p1074_p2)
}
 0x34c   : > { %s1078_s8 = scalar_lea.hbm %s1579_s29, 4096  ;;  %s1082_s10 = scalar_lea.hbm %s1634_s5, 8192 }
 0x34d   : > { %p1079_p4 = scmp.ne.s32.totalorder %s1579_s29, %s1078_s8  ;;  %p1083_p9 = scmp.lt.u32.totalorder %s1579_s29, %s1634_s5 }
 0x34e   : > { %p1084_p1 = scmp.lt.u32.totalorder %s1082_s10, %s1078_s8  ;;  %p1086_p6 = scmp.lt.u32.totalorder %s1078_s8, %s1579_s29 }
 0x34f   : > { %p1080_p5 = pnand %p1079_p4, %p1641_p11 }
 0x350   : > { %p1085_p3 = por %p1084_p1, %p1083_p9 }
 0x351   : > { %p1081_p7 = pneg %p1080_p5 }
 0x352   : > { %p1087_p12 = por %p1086_p6, %p1085_p3 }
 0x354   : > { %p1088_p13 = pnand %p1087_p12, %p1081_p7 }
 0x356   : > { %1091 = shalt.err (!%p1088_p13)
}
 0x357   : > { %s1139_s25 = smov 256   ;;  %s1140_s26 = smov 16  }
 0x358   : > { %979 = dma.vmem_to_hbm [thread:$0]  (%p1641_p11), %s1581_s17, 4096, %s1579_s29, %s789_s22, %s1139_s25, %s1139_s25, %s1140_s26  }
 0x359 PF: > { %s817_s28 = sand.u32 1, %s1118_s18   ;;  %p1642_p8 = scmp.ne.s32.totalorder %s1639_s6, 0 }
 0x35a   : > { %p1643_p10 = scmp.ge.s32.totalorder %s1130_s21, 2  ;;  %s818_s12 = scalar_lea.sflag [#allocation4], %s817_s28 }
 0x35c   : > { %p986_p0 = pnand %p1643_p10, %p1642_p8 }
 0x35e   : > { %1113 = dma.done.wait (!%p986_p0), %s818_s12, 4096  }
 0x35f   : > { %1115 = vsyncadd (!%p986_p0), %s818_s12, 4294963200  ;;  %p18_p2 = scmp.ge.s32.totalorder %s1196_s24, 4   ;;  %s1644_s18 = smov %s1122_s19 }
 0x360   : > { %s1645_s19 = smov %s1126_s20  ;;  %s1646_s20 = smov %s1208_s27 }
 0x361   : > { %s1647_s21 = smov %s1196_s24  ;;  %20 = sbr.rel (!%p18_p2) target bundleno = 5 (0x5), region = 85 }
 0x368   :  { %823 = vsyncpa [#allocation3], 1 }
 0x369   :  { %825 = vsyncpa [#allocation3 + $0x1], 1 }
 0x36a   :  { %826 = vsyncpa [#allocation4], 1 }
 0x36b   :  { %828 = vsyncpa [#allocation4 + $0x1], 1 }

</bundles_post_ra>
